<compile_context>
chip_gen: v6e
topology: v6e:2x2x1
jax: 0.10.0
libtpu: 0.0.40
codegen_flags: <defaults>
</compile_context>

<pallas_src>
import functools
import math

import jax
import jax.numpy as jnp
from jax.experimental import pallas as pl
from jax.experimental.pallas import tpu as pltpu

_SQRT_HALF = 1.0 / math.sqrt(2.0)


def _linear_net_kernel(*refs, activation: bool, layer_norm: bool,
                       approximate_gelu: bool, ln_eps: float):
    """Grid = (batch_tiles, out_tiles, k_tiles); axis 2 (K) is the reduction axis."""
    if layer_norm:
        x_ref, w_ref, b_ref, g_ref, be_ref, o_ref, acc_ref = refs
    else:
        x_ref, w_ref, b_ref, o_ref, acc_ref = refs
        g_ref = be_ref = None

    k = pl.program_id(2)

    @pl.when(k == 0)
    def _init():
        acc_ref[...] = jnp.zeros_like(acc_ref)

    # Native-dtype operands straight into the MXU; f32 accumulation in scratch.
    acc_ref[...] += jnp.dot(x_ref[...], w_ref[...],
                            preferred_element_type=jnp.float32)

    @pl.when(k == pl.num_programs(2) - 1)
    def _finalize():
        y = acc_ref[...] + b_ref[...].astype(jnp.float32)

        # TODO(synk): nn.Dropout with rate>0 (training mode) not implemented; the
        # wrapper asserts dropout_rate == 0.0 (identity, matches eval / module default).

        if activation:
            if approximate_gelu:
                # tanh GELU runs on the EUP (nearly free); opt-in, not PyTorch default.
                y = jax.nn.gelu(y, approximate=True)
            else:
                # Exact GELU (PyTorch nn.GELU default, approximate='none').
                y = 0.5 * y * (1.0 + jax.lax.erf(y * jnp.float32(_SQRT_HALF)))

        if layer_norm:
            mean = jnp.mean(y, axis=-1, keepdims=True)
            var = jnp.mean(jnp.square(y - mean), axis=-1, keepdims=True)
            y = (y - mean) * jax.lax.rsqrt(var + jnp.float32(ln_eps))
            y = y * g_ref[...].astype(jnp.float32) + be_ref[...].astype(jnp.float32)

        o_ref[...] = y.astype(o_ref.dtype)


def _pick_tile(dim: int, target: int, align: int) -> int:
    """Largest divisor of `dim` that is <= target and a multiple of `align`.
    Falls back to the full dim (always layout-legal)."""
    if dim <= target:
        return dim
    t = (target // align) * align
    while t >= align:
        if dim % t == 0:
            return t
        t -= align
    return dim


def linear_network_forward(x, w, b, gamma=None, beta=None, *,
                           activation: bool = True, layer_norm: bool = False,
                           dropout_rate: float = 0.0,
                           approximate_gelu: bool = False,
                           ln_eps: float = 1e-5,
                           batch_tile: int | None = None,
                           k_tile: int | None = None,
                           n_tile: int | None = None,
                           out_dtype=None):
    """Pallas forward of LinearNetwork.

    x: [B, in_features]; w: [in_features, out_features] (transposed vs. nn.Linear.weight);
    b / gamma / beta: [1, out_features] rows (gamma/beta only needed if layer_norm).
    """
    assert dropout_rate == 0.0, "Dropout only supported as identity (rate=0 / eval mode)."
    B, f_in = x.shape
    f_in_w, f_out = w.shape
    assert f_in_w == f_in, "weight must be [in_features, out_features]"
    out_dtype = out_dtype or x.dtype

    # Sublane packing for the batch axis depends on element width.
    sublane = {4: 8, 2: 16, 1: 32}.get(jnp.dtype(x.dtype).itemsize, 8)
    tb = _pick_tile(B, batch_tile or 256, sublane)
    tk = _pick_tile(f_in, k_tile or 512, 128)
    # LayerNorm needs the full feature row in one block; otherwise N may be tiled too.
    tn = f_out if layer_norm else _pick_tile(f_out, n_tile or 512, 128)

    grid = (B // tb, f_out // tn, f_in // tk)

    in_specs = [
        pl.BlockSpec((tb, tk), lambda i, j, k: (i, k)),   # x batch x K tile
        pl.BlockSpec((tk, tn), lambda i, j, k: (k, j)),   # weight K x N tile (streamed)
        pl.BlockSpec((1, tn), lambda i, j, k: (0, j)),    # bias row
    ]
    args = [x, w, b.reshape(1, f_out)]
    if layer_norm:
        assert gamma is not None and beta is not None
        in_specs += [
            pl.BlockSpec((1, tn), lambda i, j, k: (0, j)),  # LN gamma
            pl.BlockSpec((1, tn), lambda i, j, k: (0, j)),  # LN beta
        ]
        args += [gamma.reshape(1, f_out), beta.reshape(1, f_out)]

    kernel = functools.partial(_linear_net_kernel,
                               activation=activation, layer_norm=layer_norm,
                               approximate_gelu=approximate_gelu, ln_eps=ln_eps)

    # VMEM budget: double-buffered x / w / out tiles + f32 accumulator + param rows.
    in_isz = jnp.dtype(x.dtype).itemsize
    w_isz = jnp.dtype(w.dtype).itemsize
    out_isz = jnp.dtype(out_dtype).itemsize
    n_rows = 3 if layer_norm else 1
    footprint = (2 * tb * tk * in_isz + 2 * tk * tn * w_isz + 2 * tb * tn * out_isz
                 + tb * tn * 4 + n_rows * 2 * 8 * tn * 4)
    vmem_limit = int(min(max(2 * footprint, 32 * 1024 * 1024), 64 * 1024 * 1024))

    return pl.pallas_call(
        kernel,
        out_shape=jax.ShapeDtypeStruct((B, f_out), out_dtype),
        grid_spec=pltpu.PrefetchScalarGridSpec(
            num_scalar_prefetch=0,
            grid=grid,
            in_specs=in_specs,
            out_specs=pl.BlockSpec((tb, tn), lambda i, j, k: (i, j)),
            scratch_shapes=[pltpu.VMEM((tb, tn), jnp.float32)],
        ),
        compiler_params=pltpu.CompilerParams(
            dimension_semantics=("parallel", "parallel", "arbitrary"),
            vmem_limit_bytes=vmem_limit,
        ),
    )(*args)


def init_linear_network_params(key, in_features: int, out_features: int,
                               linear_init_scale: float = 1.0, dtype=jnp.float32):
    """Deterministic synthetic init mimicking a GELU-friendly (Kaiming-like) init."""
    kw, kb = jax.random.split(key)
    std = linear_init_scale * math.sqrt(2.0 / in_features)
    w = (std * jax.random.normal(kw, (in_features, out_features), dtype=jnp.float32)).astype(dtype)
    b = (0.01 * jax.random.normal(kb, (1, out_features), dtype=jnp.float32)).astype(dtype)
    gamma = jnp.ones((1, out_features), dtype=dtype)   # LayerNorm weight
    beta = jnp.zeros((1, out_features), dtype=dtype)   # LayerNorm bias
    return w, b, gamma, beta


def _reference_forward(x, w, b, gamma=None, beta=None, *,
                       activation=True, layer_norm=False, ln_eps=1e-5):
    y = jnp.dot(x.astype(jnp.float32), w.astype(jnp.float32),
                preferred_element_type=jnp.float32,
                precision=jax.lax.Precision.HIGHEST) + b.astype(jnp.float32)
    if activation:
        y = 0.5 * y * (1.0 + jax.lax.erf(y * jnp.float32(_SQRT_HALF)))
    if layer_norm:
        mean = jnp.mean(y, axis=-1, keepdims=True)
        var = jnp.mean(jnp.square(y - mean), axis=-1, keepdims=True)
        y = (y - mean) * jax.lax.rsqrt(var + jnp.float32(ln_eps))
        y = y * gamma.astype(jnp.float32) + beta.astype(jnp.float32)
    return y


if __name__ == "__main__":
    key = jax.random.PRNGKey(0)
    kx, kp = jax.random.split(key)

    # Small but layout-friendly shapes: f_out multiple of 128 (lane-dense stores),
    # multiple grid steps along batch (4) and K (2).
    B, F_IN, F_OUT = 64, 256, 128
    x = jax.random.normal(kx, (B, F_IN), dtype=jnp.float32)
    w, b, gamma, beta = init_linear_network_params(kp, F_IN, F_OUT, linear_init_scale=1.0)

    # 1) Module defaults: Linear -> GELU(exact), no LayerNorm, f32.
    out = linear_network_forward(x, w, b, activation=True, layer_norm=False,
                                 batch_tile=16, k_tile=128)
    out = jax.block_until_ready(out)
    ref = _reference_forward(x, w, b, activation=True, layer_norm=False)
    assert out.shape == (B, F_OUT)
    assert float(jnp.max(jnp.abs(out.astype(jnp.float32) - ref))) < 2e-3

    # 2) Linear -> GELU -> LayerNorm (full feature row per block for the LN reduction).
    out_ln = linear_network_forward(x, w, b, gamma, beta, activation=True,
                                    layer_norm=True, batch_tile=16, k_tile=128)
    out_ln = jax.block_until_ready(out_ln)
    ref_ln = _reference_forward(x, w, b, gamma, beta, activation=True, layer_norm=True)
    assert float(jnp.max(jnp.abs(out_ln.astype(jnp.float32) - ref_ln))) < 5e-3

    # 3) bf16 operands fed straight to the MXU (f32 accumulation in VMEM scratch).
    xb, wb, bb = (x.astype(jnp.bfloat16), w.astype(jnp.bfloat16), b.astype(jnp.bfloat16))
    out_bf = linear_network_forward(xb, wb, bb, activation=True, layer_norm=False,
                                    batch_tile=16, k_tile=128)
    out_bf = jax.block_until_ready(out_bf)
    assert float(jnp.max(jnp.abs(out_bf.astype(jnp.float32) - ref))) < 1e-1

    print("KERNEL_OK")
</pallas_src>

<mosaic_0001>
module attributes {stable_mosaic.version = 11 : i64} {
  func.func @_linear_net_kernel(%arg0: i32, %arg1: i32, %arg2: i32, %arg3: memref<16x128xf32, #tpu.memory_space<vmem>>, %arg4: memref<128x128xf32, #tpu.memory_space<vmem>>, %arg5: memref<1x128xf32, #tpu.memory_space<vmem>>, %arg6: memref<16x128xf32, #tpu.memory_space<vmem>>, %arg7: memref<16x128xf32, #tpu.memory_space<vmem>>) attributes {dimension_semantics = [#tpu.dimension_semantics<parallel>, #tpu.dimension_semantics<parallel>, #tpu.dimension_semantics<arbitrary>], iteration_bounds = array<i64: 4, 1, 2>, scalar_prefetch = 0 : i64, scratch_operands = 1 : i64, tpu.core_type = #tpu.core_type<tc>, window_params = [{transform_indices = @transform_0, window_bounds = array<i64: 16, 128>}, {transform_indices = @transform_1, window_bounds = array<i64: 128, 128>}, {transform_indices = @transform_2, window_bounds = array<i64: 1, 128>}, {transform_indices = @transform_3, window_bounds = array<i64: 16, 128>}]} {
    %c0_i32 = arith.constant 0 : i32
    %0 = arith.cmpi eq, %arg2, %c0_i32 : i32
    %1 = arith.extui %0 : i1 to i32
    %c0_i32_0 = arith.constant 0 : i32
    %2 = arith.cmpi ne, %1, %c0_i32_0 : i32
    scf.if %2 {
      %cst_9 = arith.constant 0.000000e+00 : f32
      %12 = vector.broadcast %cst_9 : f32 to vector<16x128xf32>
      %c0_10 = arith.constant 0 : index
      %c0_11 = arith.constant 0 : index
      %13 = vector.load %arg7[%c0_10, %c0_11] : memref<16x128xf32, #tpu.memory_space<vmem>>, vector<16x128xf32>
      tpu.vector_store %arg7[%c0_10, %c0_11], %12 {strides = array<i32>} : memref<16x128xf32, #tpu.memory_space<vmem>>, vector<16x128xf32>,
    } else {
    }
    %c0 = arith.constant 0 : index
    %c0_1 = arith.constant 0 : index
    %3 = vector.load %arg7[%c0, %c0_1] : memref<16x128xf32, #tpu.memory_space<vmem>>, vector<16x128xf32>
    %c0_2 = arith.constant 0 : index
    %c0_3 = arith.constant 0 : index
    %4 = vector.load %arg3[%c0_2, %c0_3] : memref<16x128xf32, #tpu.memory_space<vmem>>, vector<16x128xf32>
    %c0_4 = arith.constant 0 : index
    %c0_5 = arith.constant 0 : index
    %5 = vector.load %arg4[%c0_4, %c0_5] : memref<128x128xf32, #tpu.memory_space<vmem>>, vector<128x128xf32>
    %cst = arith.constant dense<0.000000e+00> : vector<16x128xf32>
    %6 = tpu.matmul %4, %5, %cst {dimension_numbers = #tpu.dot_dimension_numbers<[1], [0], [0], [1], [0, 0, 1, 1], [], []>} : vector<16x128xf32>, vector<128x128xf32>, vector<16x128xf32> -> vector<16x128xf32>
    %7 = arith.addf %3, %6 : vector<16x128xf32>
    %c0_6 = arith.constant 0 : index
    %c0_7 = arith.constant 0 : index
    %8 = vector.load %arg7[%c0_6, %c0_7] : memref<16x128xf32, #tpu.memory_space<vmem>>, vector<16x128xf32>
    tpu.vector_store %arg7[%c0_6, %c0_7], %7 {strides = array<i32>} : memref<16x128xf32, #tpu.memory_space<vmem>>, vector<16x128xf32>,
    %c1_i32 = arith.constant 1 : i32
    %9 = arith.cmpi eq, %arg2, %c1_i32 : i32
    %10 = arith.extui %9 : i1 to i32
    %c0_i32_8 = arith.constant 0 : i32
    %11 = arith.cmpi ne, %10, %c0_i32_8 : i32
    scf.if %11 {
      %c0_9 = arith.constant 0 : index
      %c0_10 = arith.constant 0 : index
      %12 = vector.load %arg7[%c0_9, %c0_10] : memref<16x128xf32, #tpu.memory_space<vmem>>, vector<16x128xf32>
      %c0_11 = arith.constant 0 : index
      %c0_12 = arith.constant 0 : index
      %13 = vector.load %arg5[%c0_11, %c0_12] : memref<1x128xf32, #tpu.memory_space<vmem>>, vector<1x128xf32>
      %14 = vector.broadcast %13 : vector<1x128xf32> to vector<16x128xf32>
      %15 = arith.addf %12, %14 : vector<16x128xf32>
      %cst_13 = arith.constant 5.000000e-01 : f32
      %16 = vector.broadcast %cst_13 : f32 to vector<16x128xf32>
      %17 = arith.mulf %16, %15 : vector<16x128xf32>
      %cst_14 = arith.constant 0.707106769 : f32
      %18 = vector.broadcast %cst_14 : f32 to vector<16x128xf32>
      %19 = arith.mulf %15, %18 : vector<16x128xf32>
      %20 = math.erf %19 : vector<16x128xf32>
      %cst_15 = arith.constant 1.000000e+00 : f32
      %21 = vector.broadcast %cst_15 : f32 to vector<16x128xf32>
      %22 = arith.addf %21, %20 : vector<16x128xf32>
      %23 = arith.mulf %17, %22 : vector<16x128xf32>
      %c0_16 = arith.constant 0 : index
      %c0_17 = arith.constant 0 : index
      %24 = vector.load %arg6[%c0_16, %c0_17] : memref<16x128xf32, #tpu.memory_space<vmem>>, vector<16x128xf32>
      tpu.vector_store %arg6[%c0_16, %c0_17], %23 {strides = array<i32>} : memref<16x128xf32, #tpu.memory_space<vmem>>, vector<16x128xf32>,
    } else {
    }
    return
  }
  func.func @transform_0(%arg0: i32, %arg1: i32, %arg2: i32) -> (i32, i32) {
    %c0_i32 = arith.constant 0 : i32
    return %arg0, %arg2 : i32, i32
  }
  func.func @transform_1(%arg0: i32, %arg1: i32, %arg2: i32) -> (i32, i32) {
    %c0_i32 = arith.constant 0 : i32
    return %arg2, %arg1 : i32, i32
  }
  func.func @transform_2(%arg0: i32, %arg1: i32, %arg2: i32) -> (i32, i32) {
    %c0_i32 = arith.constant 0 : i32
    %c0_i32_0 = arith.constant 0 : i32
    return %c0_i32, %arg1 : i32, i32
  }
  func.func @transform_3(%arg0: i32, %arg1: i32, %arg2: i32) -> (i32, i32) {
    %c0_i32 = arith.constant 0 : i32
    return %arg0, %arg1 : i32, i32
  }
}

</mosaic_0001>

<bundles_post_ra>
// kernel: tpu_custom_call.1
= control target key start
LH: loop header
LB: loop body
LE: loop exit
PB: predicated region body
PF: predicated region fallthrough
CT: control target
= control target key end

     0   :  { %s1328_s0 = inlined_call_operand.hbm [shape: f32[64,256], index: 0, kind: input, shape index: {}]   ;;  %s1329_s1 = inlined_call_operand.hbm [shape: f32[256,128], index: 1, kind: input, shape index: {}]   ;;  %s1330_s2 = inlined_call_operand.vmem [shape: f32[1,128], index: 2, kind: input, shape index: {}]   ;;  %s1331_s3 = inlined_call_operand.hbm [shape: f32[64,128], index: 3, kind: output, shape index: {}]  }
   0x1   :  { %1338 = sst [smem:[#allocation17_spill]] %s1328_s0 }
   0x2   :  { %1339 = sst [smem:[#allocation18_spill]] %s1329_s1 }
   0x3   :  { %1340 = sst [smem:[#allocation19_spill]] %s1330_s2 }
   0x4   :  { %1341 = sst [smem:[#allocation20_spill]] %s1331_s3 }
   0x5   :  { %8 = vsyncpa [#allocation4], 0 }
   0x6   :  { %10 = vsyncpa [#allocation4 + $0x1], 0 }
   0x7   :  { %11 = vsyncpa [#allocation7], 0 }
   0x8   :  { %13 = vsyncpa [#allocation7 + $0x1], 0 }
   0x9   :  { %14 = vsyncpa [#allocation5], 0 }
   0xa   :  { %16 = vsyncpa [#allocation5 + $0x1], 0  ;;  %s1005_s12 = smov 0   ;;  %s1007_s13 = smov 0  }
   0xb   :  { %s1009_s14 = smov 0   ;;  %s1011_s15 = smov 0  }
   0xc   :  { %s1013_s16 = smov 0   ;;  %s1015_s17 = smov 0  }
   0xd   :  { %s1017_s18 = smov 0   ;;  %s1019_s19 = smov 0  }
   0xe   :  { %s1021_s20 = smov 0   ;;  %s1023_s21 = smov 0  }
   0xf   :  { %s1025_s22 = smov 0   ;;  %s1027_s23 = smov 0  }
  0x10   :  { %s1029_s24 = smov 0   ;;  %s1031_s25 = smov 0  }
  0x11 LB: > { %1342 = sst [smem:[#allocation12_spill]] %s922_s12  ;;  %s34_s26 = sadd.s32 1, %s966_s23  ;;  %s974_s25 = sphi %s1031_s25, %s22_s25   ;;  %s970_s24 = sphi %s1029_s24, %s1382_s24   ;;  %s966_s23 = sphi %s1027_s23, %s1381_s23   ;;  %s962_s22 = sphi %s1025_s22, %s1380_s22   ;;  %s958_s21 = sphi %s1023_s21, %s1379_s21   ;;  %s954_s20 = sphi %s1021_s20, %s1378_s20   ;;  %s950_s19 = sphi %s1019_s19, %s1377_s19   ;;  %s946_s18 = sphi %s1017_s18, %s1376_s18   ;;  %s942_s17 = sphi %s1015_s17, %s1375_s17   ;;  %s938_s16 = sphi %s1013_s16, %s1374_s16   ;;  %s934_s15 = sphi %s1011_s15, %s1373_s15   ;;  %s930_s14 = sphi %s1009_s14, %s1372_s14   ;;  %s926_s13 = sphi %s1007_s13, %s1371_s13   ;;  %s922_s12 = sphi %s1005_s12, %s1370_s12  }
  0x12   : > { %1343 = sst [smem:[#allocation13_spill]] %s958_s21  ;;  %s41_s27 = sadd.s32 1, %s970_s24 }
  0x13   : > { %1344 = sst [smem:[#allocation14_spill]] %s962_s22  ;;  %p35_p0 = scmp.ge.s32.totalorder %s34_s26, 2 }
  0x14   : > { %s50_s28 = sadd.s32 1, %s954_s20  ;;  %p57_p1 = scmp.ne.s32.totalorder %s954_s20, %s950_s19 }
  0x15   : > { %p58_p2 = scmp.eq.s32.totalorder %s974_s25, 0  ;;  %s1384_s26 = smov (%p35_p0, %s34_s26), 0 }
  0x16   : > { %1345 = sst [smem:[#allocation15_spill]] %s1384_s26  ;;  %s1386_s27 = smov (!%p35_p0, %s41_s27), %s970_s24 }
  0x17   : > { %s1086_s29 = ssub.s32 %s966_s23, %s1384_s26  ;;  %p1090_p3 = por %p58_p2, %p57_p1 }
  0x18   : > { %p43_p4 = scmp.ge.s32.totalorder %s1386_s27, 4  ;;  %p63_p5 = scmp.ne.s32.totalorder %s950_s19, %s946_s18 }
  0x19   : > { %p76_p6 = scmp.eq.s32.totalorder %s1086_s29, 0  ;;  %s132_s4 = sadd.s32 1, %s930_s14 }
  0x1a   : > { %s1388_s27 = smov (%p43_p4, %s1386_s27), 0  ;;  %p1334_p7 = scmp.lt.s32.totalorder %s974_s25, 8 }
  0x1b   : > { %1347 = sst [smem:[#allocation16_spill]] %s1388_s27  ;;  %s45_s5 = ssub.s32 %s970_s24, %s1388_s27 }
  0x1c   : > { %s175_s6 = sand.u32 1, %s954_s20   ;;  %s47_s7 = sor.u32 %s1086_s29, %s45_s5 }
  0x1d   : > { %p130_p8 = scmp.eq.s32.totalorder %s45_s5, 0  ;;  %p48_p9 = scmp.eq.s32.totalorder %s47_s7, 0 }
  0x1e   : > { %s554_s10 = sshll.u32 %s175_s6, 4  ;;  %s573_s11 = sshll.u32 %s970_s24, 2 }
  0x1f   : > { %s1106_s8 = scalar_select %p130_p8, %s930_s14, %s132_s4  }
  0x20   : > { %s1109_s9 = scalar_select %p48_p9, %s954_s20, %s50_s28  }
  0x21   : > { %s185_s26 = sadd.s32 %s966_s23, %s573_s11  ;;  %s179_s22 = scalar_lea.vmem [#allocation3], %s554_s10 }
  0x22   : > { %s557_s3 = sshll.u32 %s185_s26, 7  ;;  %s188_s2 = sshll.u32 %s179_s22, 4  ;;  %s189_s2 = int_to_ptr.vmem [resolvable:$true] %s188_s2 }
  0x23   : > { %s1348_s0 = sld [smem:[#allocation17_spill]]  ;;  %p1120_p10 = pnand %p1334_p7, %p1090_p3 }
  0x24   : > { %p561_p11 = scmp.ge.s32.totalorder %s974_s25, 1  ;;  %s176_s28 = scalar_lea.sflag [#allocation4], %s175_s6 }
  0x25   : > { %p772_p12 = pneg %p1120_p10  ;;  %s783_s4 = scalar_lea.vmem %s189_s2, 256 }
  0x26   : > { %p784_p13 = scmp.ne.s32.totalorder %s189_s2, %s783_s4  ;;  %s976_s22 = smov [#allocation3]  }
  0x27   : > { %s788_s26 = sshll.u32 %s976_s22, 4  ;;  %s789_s26 = int_to_ptr.vmem [resolvable:$false] %s788_s26 }
  0x28   : > { %p786_p0 = pnand %p784_p13, %p772_p12  ;;  %s790_s1 = scalar_lea.vmem %s789_s26, 512 }
  0x29   : > { %s187_s12 = scalar_lea.hbm %s1348_s0, %s557_s3  ;;  %p791_p4 = scmp.lt.s32.totalorder %s189_s2, %s789_s26 }
  0x2a   : > { %p787_p1 = pneg %p786_p0  ;;  %p792_p8 = scmp.lt.s32.totalorder %s790_s1, %s783_s4 }
  0x2c   : > { %p793_p9 = por %p792_p8, %p791_p4 }
  0x2e   : > { %p794_p3 = pnand %p793_p9, %p787_p1 }
  0x30   : > { %797 = shalt.err (!%p794_p3)
}
  0x31   : > { %s977_s3 = smov 256   ;;  %s1335_s21 = smov 128  }
  0x32   : > { %s1336_s30 = smov 8   ;;  %s1350_s6 = sld [smem:[#allocation12_spill]] }
  0x33   : > { %638 = dma.hbm_to_vmem [thread:$0]  (!%p1120_p10), %s187_s12, 256, %s189_s2, %s176_s28, %s977_s3, %s1335_s21, %s1336_s30  }
  0x34   : > { %p218_p12 = scmp.lt.s32.totalorder %s974_s25, 9  ;;  %s549_s10 = sadd.s32 4294967295, %s974_s25  }
  0x35   : > { %s550_s11 = sadd.s32 4294967294, %s974_s25   ;;  %p64_p0 = scmp.eq.s32.totalorder %s549_s10, 0 }
  0x36   : > { %p1134_p13 = pnand %p561_p11, %p218_p12  ;;  %s78_s4 = sadd.s32 1, %s942_s17 }
  0x37   : > { %s1144_s22 = scalar_select %p76_p6, %s942_s17, %s78_s4  }
  0x38   : > { %p1149_p1 = por %p64_p0, %p63_p5  ;;  %p85_p10 = scmp.ne.s32.totalorder %s942_s17, %s938_s16 }
  0x39   : > { %p91_p11 = scmp.ne.s32.totalorder %s938_s16, %s934_s15  ;;  %p142_p4 = scmp.ne.s32.totalorder %s930_s14, %s926_s13 }
  0x3a   : > { %p87_p8 = por %p85_p10, %p58_p2  ;;  %p143_p9 = scmp.eq.s32.totalorder %s549_s10, 7 }
  0x3b   : > { %p1161_p3 = por %p91_p11, %p64_p0  ;;  %p148_p12 = scmp.ne.s32.totalorder %s926_s13, %s1350_s6 }
  0x3c   : > { %p1167_p7 = por %p143_p9, %p142_p4  ;;  %p149_p6 = scmp.eq.s32.totalorder %s550_s11, 7 }
  0x3d   : > { %s198_s18 = sand.u32 1, %s942_s17   ;;  %s574_s29 = sshll.u32 %s966_s23, 11 }
  0x3e   : > { %p1173_p5 = por %p149_p6, %p148_p12  ;;  %s558_s15 = sshll.u32 %s198_s18, 7 }
  0x3f   : > { %s1356_s3 = sld [smem:[#allocation18_spill]]  ;;  %p1357_p2 = scmp.lt.s32.totalorder %s974_s25, 8 }
  0x40   : > { %s202_s6 = scalar_lea.vmem [#allocation6], %s558_s15  ;;  %s199_s11 = scalar_lea.sflag [#allocation7], %s198_s18 }
  0x41   : > { %p1182_p0 = pnand %p1357_p2, %p87_p8  ;;  %s210_s21 = sshll.u32 %s202_s6, 4  ;;  %s211_s21 = int_to_ptr.vmem [resolvable:$true] %s210_s21 }
  0x42   : > { %s811_s30 = scalar_lea.vmem %s211_s21, 2048  ;;  %s980_s0 = smov [#allocation6]  }
  0x43   : > { %p800_p10 = pneg %p1182_p0  ;;  %p812_p11 = scmp.ne.s32.totalorder %s211_s21, %s811_s30 }
  0x44   : > { %s816_s27 = sshll.u32 %s980_s0, 4  ;;  %s817_s27 = int_to_ptr.vmem [resolvable:$false] %s816_s27 }
  0x45   : > { %s209_s10 = scalar_lea.hbm %s1356_s3, %s574_s29  ;;  %p814_p4 = pnand %p812_p11, %p800_p10 }
  0x46   : > { %s818_s29 = scalar_lea.vmem %s817_s27, 4096  ;;  %p819_p12 = scmp.lt.s32.totalorder %s211_s21, %s817_s27 }
  0x47   : > { %p815_p9 = pneg %p814_p4  ;;  %p820_p8 = scmp.lt.s32.totalorder %s818_s29, %s811_s30 }
  0x49   : > { %p821_p6 = por %p820_p8, %p819_p12 }
  0x4b   : > { %p822_p2 = pnand %p821_p6, %p815_p9 }
  0x4d   : > { %825 = shalt.err (!%p822_p2)
}
  0x4e   : > { %s1359_s15 = smov 8   ;;  %s1360_s26 = smov 128  }
  0x4f   : > { %641 = dma.hbm_to_vmem [thread:$0]  (!%p1182_p0), %s209_s10, 2048, %s211_s21, %s199_s11, %s1360_s26, %s1360_s26, %s1359_s15  }
  0x50   : > { %222 = sbr.rel (%p1134_p13) target bundleno = 392 (0x188), region = 32  ;;  %s224_s18 = sand.u32 (!%p1134_p13), 1, %s950_s19  }
  0x51   : > { %s1196_s0 = sshll.u32 (!%p1134_p13), %s224_s18, 4  ;;  %s225_s27 = scalar_lea.sflag (!%p1134_p13), [#allocation4], %s224_s18 }
  0x52   : > { %s228_s30 = scalar_lea.vmem (!%p1134_p13), [#allocation3], %s1196_s0 }
  0x55   : > { %909 = dma.done.wait (%p1149_p1), %s225_s27, 256  }
  0x56   : > { %911 = vsyncadd (%p1149_p1), %s225_s27, 4294967040  ;;  %s233_s1 = sand.u32 1, %s938_s16  }
  0x57   : > { %s563_s21 = sshll.u32 %s233_s1, 7  ;;  %s234_s3 = scalar_lea.sflag [#allocation7], %s233_s1 }
  0x58   : > { %s1204_s7 = scalar_lea.vmem [#allocation6], %s563_s21 }
  0x59   : > { %913 = dma.done.wait (%p1161_p3), %s234_s3, 2048  }
  0x5a   : > { %915 = vsyncadd (%p1161_p3), %s234_s3, 4294965248  ;;  %s265_s10 = sand.u32 1, %s926_s13   ;;  %s1361_s5 = sld [smem:[#allocation13_spill]] }
  0x5b   : > { %s564_s4 = sshll.u32 %s265_s10, 4 }
  0x5c   : > { %s1213_s6 = scalar_lea.vmem [#allocation8], %s564_s4 }
  0x60   : > { %p565_p13 = scmp.ne.s32.totalorder %s1361_s5, 0 }
  0x62   : > { %277 = sbr.rel (%p565_p13) target bundleno = 105 (0x69), region = 44 }
  0x67   : > { %v981_v0 = vmov 0.0  }
  0x68   : > { %278 = vst [vmem:[#allocation2] sm:$0xff] %v981_v0  ;;  %279 = vst [vmem:[#allocation2 + $0x8] sm:$0xff] %v981_v0 }
  0x69 PF: > { %v299_v1 = vld [vmem:[%s1204_s7 + $0x78] sm:$0xff]  ;;  %v298_v2 = vld [vmem:[%s1204_s7 + $0x70] sm:$0xff]  ;;  %v297_v3 = vld [vmem:[%s1204_s7 + $0x68] sm:$0xff]  ;;  %s1362_s2 = sld [smem:[#allocation13_spill]] }
  0x6a   : > { %594 = vmatprep.subr.mxu0 %v299_v1  ;;  %v296_v4 = vld [vmem:[%s1204_s7 + $0x60] sm:$0xff]  ;;  %v295_v6 = vld [vmem:[%s1204_s7 + $0x58] sm:$0xff]  ;;  %v294_v7 = vld [vmem:[%s1204_s7 + $0x50] sm:$0xff] }
  0x6b   : > { %595 = vmatpush3.msra.mxu0 %v299_v1  ;;  %v282_v5 = vld [vmem:[%s228_s30] sm:$0xff]  ;;  %v293_v8 = vld [vmem:[%s1204_s7 + $0x48] sm:$0xff]  ;;  %v291_v10 = vld [vmem:[%s1204_s7 + $0x38] sm:$0xff] }
  0x6c   : > { %596 = vmatprep.subr.mxu0 %v298_v2  ;;  %626 = vmatprep.mubr.f32.mxu0 %v282_v5  ;;  %v292_v9 = vld [vmem:[%s1204_s7 + $0x40] sm:$0xff]  ;;  %v290_v11 = vld [vmem:[%s1204_s7 + $0x30] sm:$0xff]  ;;  %v289_v12 = vld [vmem:[%s1204_s7 + $0x28] sm:$0xff] }
  0x6d   : > { %597 = vmatpush3.msra.mxu0 %v298_v2  ;;  %v288_v13 = vld [vmem:[%s1204_s7 + $0x20] sm:$0xff]  ;;  %v287_v14 = vld [vmem:[%s1204_s7 + $0x18] sm:$0xff]  ;;  %v286_v15 = vld [vmem:[%s1204_s7 + $0x10] sm:$0xff] }
  0x6e   : > { %598 = vmatprep.subr.mxu0 %v297_v3  ;;  %v285_v16 = vld [vmem:[%s1204_s7 + $0x8] sm:$0xff]  ;;  %v284_v17 = vld [vmem:[%s1204_s7] sm:$0xff] }
  0x6f   : > { %599 = vmatpush3.msra.mxu0 %v297_v3  ;;  %v283_v18 = vld [vmem:[%s228_s30 + $0x8] sm:$0xff]  ;;  %v280_v21 = vld [vmem:[#allocation2] sm:$0xff]  ;;  %p566_p1 = scmp.ne.s32.totalorder %s1362_s2, 1 }
  0x70   : > { %600 = vmatprep.subr.mxu0 %v296_v4  ;;  %v281_v19 = vld [vmem:[#allocation2 + $0x8] sm:$0xff]  ;;  %s1363_s15 = sld [smem:[#allocation19_spill]] (!%p566_p1) }
  0x71   : > { %601 = vmatpush3.msra.mxu0 %v296_v4 }
  0x72   : > { %602 = vmatprep.subr.mxu0 %v295_v6 }
  0x73   : > { %603 = vmatpush3.msra.mxu0 %v295_v6 }
  0x74   : > { %604 = vmatprep.subr.mxu0 %v294_v7 }
  0x75   : > { %605 = vmatpush3.msra.mxu0 %v294_v7 }
  0x76   : > { %606 = vmatprep.subr.mxu0 %v293_v8 }
  0x77   : > { %607 = vmatpush3.msra.mxu0 %v293_v8 }
  0x78   : > { %608 = vmatprep.subr.mxu0 %v292_v9 }
  0x79   : > { %609 = vmatpush3.msra.mxu0 %v292_v9 }
  0x7a   : > { %610 = vmatprep.subr.mxu0 %v291_v10 }
  0x7b   : > { %611 = vmatpush3.msra.mxu0 %v291_v10 }
  0x7c   : > { %612 = vmatprep.subr.mxu0 %v290_v11 }
  0x7d   : > { %613 = vmatpush3.msra.mxu0 %v290_v11 }
  0x7e   : > { %614 = vmatprep.subr.mxu0 %v289_v12 }
  0x7f   : > { %615 = vmatpush3.msra.mxu0 %v289_v12 }
  0x80   : > { %616 = vmatprep.subr.mxu0 %v288_v13 }
  0x81   : > { %617 = vmatpush3.msra.mxu0 %v288_v13 }
  0x82   : > { %618 = vmatprep.subr.mxu0 %v287_v14 }
  0x83   : > { %619 = vmatpush3.msra.mxu0 %v287_v14 }
  0x84   : > { %620 = vmatprep.subr.mxu0 %v286_v15 }
  0x85   : > { %621 = vmatpush3.msra.mxu0 %v286_v15 }
  0x86   : > { %622 = vmatprep.subr.mxu0 %v285_v16 }
  0x87   : > { %623 = vmatpush3.msra.mxu0 %v285_v16 }
  0x88   : > { %624 = vmatprep.subr.mxu0 %v284_v17 }
  0x89   : > { %625 = vmatpush3.msra.mxu0 %v284_v17 }
  0x8a   : > { %627 = vmatmul.mubr.f32.vlgmr.msra.gmra.mxu0 %v283_v18 }
 0x14a   : > { %v628_v20 = vpop.f32.mrf.mxu0 }
 0x14b   : > { %v376_v22 = vadd.f32 %v628_v20, %v281_v19  ;;  %382 = sbr.rel (%p566_p1) target bundleno = 367 (0x16f), region = 48 }
 0x14c   : > { %v366_v23 = vpop.f32.mrf.mxu0 }
 0x14d   : > { %378 = vst [vmem:[#allocation2 + $0x8] sm:$0xff] %v376_v22  ;;  %v375_v24 = vadd.f32 %v366_v23, %v280_v21 }
 0x14f   : > { %377 = vst [vmem:[#allocation2] sm:$0xff] %v375_v24 }
 0x150   : > { %v567_v26 = vld [vmem:[%s1363_s15] ss:$0 sm:$0xff] }
 0x154   : > { %v384_v27 = vld [vmem:[#allocation2 + $0x8] sm:$0xff] }
 0x155   : > { %v393_v29 = vadd.f32 %v567_v26, %v384_v27 }
 0x156   : > { %v383_v25 = vld [vmem:[#allocation2] sm:$0xff] }
 0x157   : > { %v392_v28 = vadd.f32 %v567_v26, %v383_v25  ;;  %v397_v31 = vmul.f32 0.70710677, %v393_v29  ;;  %v395_v34 = vmul.f32 0.5, %v393_v29 }
 0x159   : > { %v396_v30 = vmul.f32 0.70710677, %v392_v28  ;;  %v394_v32 = vmul.f32 0.5, %v392_v28 }
 0x15b   : > { %766 = verf.f32 %v396_v30 }
 0x15c   : > { %768 = verf.f32 %v397_v31 }
 0x168   : > { %v767_v33 = vpop.eup %766 }
 0x169   : > { %v769_v35 = vpop.eup %768  ;;  %v400_v36 = vadd.f32 1.0, %v767_v33 }
 0x16a   : > { %v401_v37 = vadd.f32 1.0, %v769_v35 }
 0x16b   : > { %v402_v38 = vmul.f32 %v400_v36, %v394_v32 }
 0x16c   : > { %v403_v39 = vmul.f32 %v401_v37, %v395_v34 }
 0x16d   : > { %404 = vst [vmem:[%s1213_s6] sm:$0xff] %v402_v38 }
 0x16e   : > { %405 = vst [vmem:[%s1213_s6 + $0x8] sm:$0xff] %v403_v39 }
 0x16f PF: > { %s1364_s26 = sld [smem:[#allocation14_spill]]  ;;  %s421_s21 = sshll.u32 %s1213_s6, 4  ;;  %s1249_s21 = int_to_ptr.vmem [resolvable:$true] %s421_s21 }
 0x170   : > { %s1365_s30 = sld [smem:[#allocation20_spill]]  ;;  %s1253_s3 = scalar_lea.sflag [#allocation5], %s265_s10 }
 0x171   : > { %s826_s7 = scalar_lea.vmem %s1249_s21, 256  ;;  %s982_s4 = smov [#allocation8]  }
 0x172   : > { %p827_p3 = scmp.ne.s32.totalorder %s1249_s21, %s826_s7  ;;  %s830_s5 = sshll.u32 %s982_s4, 4  ;;  %s831_s5 = int_to_ptr.vmem [resolvable:$false] %s830_s5 }
 0x173   : > { %s832_s2 = scalar_lea.vmem %s831_s5, 512  ;;  %p833_p11 = scmp.lt.s32.totalorder %s1249_s21, %s831_s5 }
 0x174   : > { %p828_p0 = pnand %p827_p3, %p1167_p7  ;;  %p834_p4 = scmp.lt.s32.totalorder %s832_s2, %s826_s7 }
 0x175   : > { %s575_s18 = sshll.u32 %s1364_s26, 8 }
 0x176   : > { %s1246_s1 = scalar_lea.hbm %s1365_s30, %s575_s18  ;;  %p829_p10 = pneg %p828_p0 }
 0x177   : > { %p835_p9 = por %p834_p4, %p833_p11 }
 0x179   : > { %p836_p12 = pnand %p835_p9, %p829_p10 }
 0x17b   : > { %839 = shalt.err (!%p836_p12)
}
 0x17c   : > { %s840_s10 = scalar_lea.hbm %s1246_s1, 256  ;;  %s844_s29 = scalar_lea.hbm %s1365_s30, 1024 }
 0x17d   : > { %p841_p8 = scmp.ne.s32.totalorder %s1246_s1, %s840_s10  ;;  %p845_p13 = scmp.lt.s32.totalorder %s1246_s1, %s1365_s30 }
 0x17e   : > { %p846_p1 = scmp.lt.s32.totalorder %s844_s29, %s840_s10 }
 0x17f   : > { %p842_p6 = pnand %p841_p8, %p1167_p7 }
 0x180   : > { %p847_p3 = por %p846_p1, %p845_p13 }
 0x181   : > { %p843_p2 = pneg %p842_p6 }
 0x183   : > { %p848_p0 = pnand %p847_p3, %p843_p2 }
 0x185   : > { %851 = shalt.err (!%p848_p0)
}
 0x186   : > { %s983_s18 = smov 128   ;;  %s984_s0 = smov 8  }
 0x187   : > { %633 = dma.vmem_to_hbm [thread:$0]  (%p1167_p7), %s1249_s21, 256, %s1246_s1, %s1253_s3, %s983_s18, %s983_s18, %s984_s0  }
 0x188 PF: > { %s1366_s27 = sld [smem:[#allocation12_spill]]  ;;  %p647_p10 = scmp.ge.s32.totalorder %s974_s25, 2 }
 0x18a   : > { %p643_p11 = pnand %p647_p10, %p1173_p5 }
 0x18c   : > { %p644_p4 = pneg %p643_p11 }
 0x18e   : > { %s436_s7 = sand.u32 1, %s1366_s27  }
 0x18f   : > { %s437_s4 = scalar_lea.sflag [#allocation5], %s436_s7 }
 0x190   : > { %917 = dma.done.wait (%p644_p4), %s437_s4, 256  }
 0x191   : > { %919 = vsyncadd (%p644_p4), %s437_s4, 4294967040  ;;  %s22_s25 = sadd.s32 1, %s974_s25   ;;  %s1368_s28 = sld [smem:[#allocation15_spill]] }
 0x192   : > { %p1281_p9 = scmp.ge.s32.totalorder %s22_s25, 10   ;;  %s1369_s1 = sld [smem:[#allocation16_spill]] }
 0x193   : > { %s1370_s12 = smov %s926_s13  ;;  %s1371_s13 = smov %s930_s14 }
 0x194   : > { %s1372_s14 = smov %s1106_s8  ;;  %s1373_s15 = smov %s938_s16 }
 0x195   : > { %s1374_s16 = smov %s942_s17  ;;  %s1375_s17 = smov %s1144_s22 }
 0x196   : > { %s1376_s18 = smov %s950_s19  ;;  %s1377_s19 = smov %s954_s20 }
 0x197   : > { %s1378_s20 = smov %s1109_s9  ;;  %s1379_s21 = smov %s966_s23 }
 0x198   : > { %s1380_s22 = smov %s970_s24  ;;  %s1381_s23 = smov %s1368_s28 }
 0x199   : > { %s1382_s24 = smov %s1369_s1  ;;  %21 = sbr.rel (!%p1281_p9) target bundleno = 17 (0x11), region = 101 }
 0x19e   :  { %442 = vsyncpa [#allocation4], 1 }
 0x19f   :  { %444 = vsyncpa [#allocation4 + $0x1], 1 }
 0x1a0   :  { %445 = vsyncpa [#allocation7], 1 }
 0x1a1   :  { %447 = vsyncpa [#allocation7 + $0x1], 1 }
 0x1a2   :  { %448 = vsyncpa [#allocation5], 1 }
 0x1a3   :  { %450 = vsyncpa [#allocation5 + $0x1], 1 }

</bundles_post_ra>
